<compile_context>
chip_gen: v7x
topology: tpu7x:2x2x1
jax: 0.10.0
libtpu: 0.0.40
codegen_flags: <defaults>
</compile_context>

<pallas_src>
import jax
import jax.numpy as jnp
from jax.experimental import pallas as pl
from jax.experimental.pallas import tpu as pltpu


def _gold_diff_kernel(x_ref, ids_ref, w_enc_ref, w_gen_t_ref, out_ref,
                      h_buf, g_acc):
    """Gold log-prob difference for one (batch block, V tile) grid step.

    x_ref     : (1, R, H)  bf16  source embeddings, R = BB*S rows
    ids_ref   : (1, R, 2)  i32   [:, :, 0] = tgt ids, [:, :, 1] = tgt2 ids
    w_enc_ref : (H, H)     bf16  synthetic "encoder" projection (grid-invariant)
    w_gen_t_ref:(TV, H)    bf16  generator weight, transposed, V-tile slice
    out_ref   : (1, 1, BB) f32   per-example gold_score(tgt) - gold_score(tgt2)
    h_buf     : (R, H)     f32   scratch: encoder hidden states
    g_acc     : (R, H)     f32   scratch: accumulated w_gen[:,t1]-w_gen[:,t2]
    """
    R, H = h_buf.shape
    TV = w_gen_t_ref.shape[0]
    BB = out_ref.shape[2]
    S = R // BB

    v = pl.program_id(1)
    nv = pl.num_programs(1)

    @pl.when(v == 0)
    def _():
        # Encoder projection + tanh, once per batch block (bf16 MXU, f32 acc).
        # (For real model sizes, pad H to a multiple of 256 to fill the MXU K.)
        h_buf[...] = jnp.tanh(
            jnp.dot(x_ref[0], w_enc_ref[...],
                    preferred_element_type=jnp.float32))
        g_acc[...] = jnp.zeros_like(g_acc)

    # logsumexp cancellation: logp[t1] - logp[t2] == logits[t1] - logits[t2],
    # so gather (w_gen[:, t1] - w_gen[:, t2]) via a one-hot-difference MXU
    # contraction instead of materializing (R, V) logits.
    ids = ids_ref[0]                                   # (R, 2) i32
    t1 = ids[:, 0:1]                                   # (R, 1)
    t2 = ids[:, 1:2]                                   # (R, 1)
    vocab = jax.lax.broadcasted_iota(jnp.int32, (R, TV), 1) + v * TV
    oh_diff = ((vocab == t1).astype(jnp.bfloat16)
               - (vocab == t2).astype(jnp.bfloat16))   # (R, TV) in {-1,0,1}
    g_acc[...] += jnp.dot(oh_diff, w_gen_t_ref[...],
                          preferred_element_type=jnp.float32)   # (R, H)

    @pl.when(v == nv - 1)
    def _():
        # per_row[r] = <h[r], w_gen[:, t1[r]] - w_gen[:, t2[r]]>
        per_row = jnp.sum(h_buf[...] * g_acc[...], axis=1, keepdims=True)  # (R,1)
        # Per-example (segment) reduction over S consecutive rows, kept 2-D.
        r_idx = jax.lax.broadcasted_iota(jnp.int32, (R, BB), 0)
        b_idx = jax.lax.broadcasted_iota(jnp.int32, (R, BB), 1)
        seg = ((r_idx >= b_idx * S) & (r_idx < (b_idx + 1) * S)).astype(jnp.float32)
        out_ref[0] = jnp.sum(per_row * seg, axis=0, keepdims=True)        # (1, BB)


def _round_up(x, m):
    return ((x + m - 1) // m) * m


def _choose_block_b(B, S, target_rows=256):
    """Examples per grid step: aim for BB*S ~ 256 MXU rows, but keep at least
    two batch blocks (v7x megacore) when the batch allows it."""
    bb = max(1, target_rows // S)
    if B >= 2:
        bb = min(bb, (B + 1) // 2)
    return max(1, min(bb, B))


def _choose_block_v(V, target=512):
    """V-tile size: 8-aligned; whole (padded) V if it is small."""
    if V <= target:
        return _round_up(V, 8)
    return target


def gold_scorer_forward(src_embed, w_enc, w_gen, tgt_ids, tgt2_ids,
                        block_b=None, block_v=None):
    """Returns per-example gold score difference, shape (B,), float32."""
    B, S, H = src_embed.shape
    V = w_gen.shape[1]

    BB = _choose_block_b(B, S) if block_b is None else block_b
    Bp = _round_up(B, BB)
    nb = Bp // BB
    R = BB * S

    TV = _choose_block_v(V) if block_v is None else block_v
    Vp = _round_up(V, TV)
    nv = Vp // TV

    def pad_batch(a):
        if Bp == B:
            return a
        return jnp.pad(a, [(0, Bp - B)] + [(0, 0)] * (a.ndim - 1))

    # Layout plumbing in the wrapper (guaranteed-free): collapse (B,S,H) to
    # per-block row slabs, pack both id columns, transpose + V-pad w_gen.
    x = pad_batch(src_embed).astype(jnp.bfloat16).reshape(nb, R, H)
    ids = jnp.stack(
        [pad_batch(tgt_ids).astype(jnp.int32),
         pad_batch(tgt2_ids).astype(jnp.int32)], axis=-1).reshape(nb, R, 2)
    w_enc_bf = w_enc.astype(jnp.bfloat16)
    w_gen_t = jnp.pad(w_gen.T, ((0, Vp - V), (0, 0))).astype(jnp.bfloat16)

    cost = pl.CostEstimate(
        flops=2 * Bp * S * H * (H + Vp),
        transcendentals=Bp * S * H,
        bytes_accessed=(x.size * 2 + ids.size * 4 + w_enc_bf.size * 2
                        + w_gen_t.size * 2 * nb + nb * BB * 4),
    )

    out = pl.pallas_call(
        _gold_diff_kernel,
        out_shape=jax.ShapeDtypeStruct((nb, 1, BB), jnp.float32),
        grid_spec=pltpu.PrefetchScalarGridSpec(
            num_scalar_prefetch=0,
            grid=(nb, nv),
            in_specs=[
                pl.BlockSpec((1, R, H), lambda b, v: (b, 0, 0)),   # src rows
                pl.BlockSpec((1, R, 2), lambda b, v: (b, 0, 0)),   # packed ids
                pl.BlockSpec((H, H), lambda b, v: (0, 0),
                             pipeline_mode=pl.Buffered(1)),        # invariant
                pl.BlockSpec((TV, H), lambda b, v: (v, 0)),        # w_gen^T tile
            ],
            out_specs=pl.BlockSpec((1, 1, BB), lambda b, v: (b, 0, 0)),
            scratch_shapes=[
                pltpu.VMEM((R, H), jnp.float32),   # h_buf
                pltpu.VMEM((R, H), jnp.float32),   # g_acc
            ],
        ),
        compiler_params=pltpu.CompilerParams(
            dimension_semantics=("parallel", "arbitrary"),
            vmem_limit_bytes=64 * 1024 * 1024,
        ),
        cost_estimate=cost,
    )(x, ids, w_enc_bf, w_gen_t)

    return out.reshape(Bp)[:B]


def gold_scorer_reference(src_embed, w_enc, w_gen, tgt_ids, tgt2_ids):
    """Pure-JAX reference (full log-softmax), with the same bf16 operand
    rounding as the kernel's MXU matmuls."""
    xb = src_embed.astype(jnp.bfloat16).astype(jnp.float32)
    web = w_enc.astype(jnp.bfloat16).astype(jnp.float32)
    wgb = w_gen.astype(jnp.bfloat16).astype(jnp.float32)
    h = jnp.tanh(jnp.einsum("bsh,hk->bsk", xb, web))
    logits = jnp.einsum("bsk,kv->bsv", h, wgb)
    logp = jax.nn.log_softmax(logits, axis=-1)
    lp1 = jnp.take_along_axis(logp, tgt_ids[..., None], axis=-1)[..., 0]
    lp2 = jnp.take_along_axis(logp, tgt2_ids[..., None], axis=-1)[..., 0]
    return jnp.sum(lp1 - lp2, axis=-1)


if __name__ == "__main__":
    # Small shapes; chosen so the grid exercises nb=2 batch blocks (megacore)
    # and nv=2 V tiles (accumulation + finalize path).
    B, S, H, V = 8, 8, 32, 256

    key = jax.random.PRNGKey(0)
    k_x, k_we, k_wg, k_t1, k_t2 = jax.random.split(key, 5)

    src_embed = jax.random.normal(k_x, (B, S, H), dtype=jnp.float32)
    w_enc = jax.random.normal(k_we, (H, H), dtype=jnp.float32) * 0.1
    w_gen = jax.random.normal(k_wg, (H, V), dtype=jnp.float32) * 0.1
    tgt_ids = jax.random.randint(k_t1, (B, S), 0, V, dtype=jnp.int32)
    tgt2_ids = jax.random.randint(k_t2, (B, S), 0, V, dtype=jnp.int32)

    out = gold_scorer_forward(src_embed, w_enc, w_gen, tgt_ids, tgt2_ids,
                              block_v=128)
    out = jax.block_until_ready(out)

    ref = gold_scorer_reference(src_embed, w_enc, w_gen, tgt_ids, tgt2_ids)
    assert out.shape == (B,)
    assert jnp.allclose(out, ref, atol=5e-3, rtol=5e-3), (out, ref)

    print("KERNEL_OK")
</pallas_src>

<mosaic_0001>
module attributes {stable_mosaic.version = 11 : i64} {
  func.func @_gold_diff_kernel(%arg0: i32, %arg1: i32, %arg2: memref<1x32x32xbf16, #tpu.memory_space<vmem>>, %arg3: memref<1x32x2xi32, #tpu.memory_space<vmem>>, %arg4: memref<32x32xbf16, #tpu.memory_space<vmem>>, %arg5: memref<128x32xbf16, #tpu.memory_space<vmem>>, %arg6: memref<1x1x4xf32, #tpu.memory_space<vmem>>, %arg7: memref<32x32xf32, #tpu.memory_space<vmem>>, %arg8: memref<32x32xf32, #tpu.memory_space<vmem>>) attributes {dimension_semantics = [#tpu.dimension_semantics<parallel>, #tpu.dimension_semantics<arbitrary>], iteration_bounds = array<i64: 2, 2>, scalar_prefetch = 0 : i64, scratch_operands = 2 : i64, tpu.core_type = #tpu.core_type<tc>, window_params = [{transform_indices = @transform_0, window_bounds = array<i64: 1, 32, 32>}, {transform_indices = @transform_1, window_bounds = array<i64: 1, 32, 2>}, {pipeline_mode = #tpu.pipeline_mode<synchronous>, transform_indices = @transform_2, window_bounds = array<i64: 32, 32>}, {transform_indices = @transform_3, window_bounds = array<i64: 128, 32>}, {transform_indices = @transform_4, window_bounds = array<i64: 1, 1, 4>}]} {
    %c0_i32 = arith.constant 0 : i32
    %0 = arith.cmpi eq, %arg1, %c0_i32 : i32
    %1 = arith.extui %0 : i1 to i32
    %c0_i32_0 = arith.constant 0 : i32
    %2 = arith.cmpi ne, %1, %c0_i32_0 : i32
    scf.if %2 {
      %c0_10 = arith.constant 0 : index
      %c0_11 = arith.constant 0 : index
      %c0_12 = arith.constant 0 : index
      %30 = vector.load %arg2[%c0_10, %c0_11, %c0_12] : memref<1x32x32xbf16, #tpu.memory_space<vmem>>, vector<1x32x32xbf16>
      %31 = vector.shape_cast %30 : vector<1x32x32xbf16> to vector<32x32xbf16>
      %c0_13 = arith.constant 0 : index
      %c0_14 = arith.constant 0 : index
      %32 = vector.load %arg4[%c0_13, %c0_14] : memref<32x32xbf16, #tpu.memory_space<vmem>>, vector<32x32xbf16>
      %cst_15 = arith.constant dense<0.000000e+00> : vector<32x32xf32>
      %33 = tpu.matmul %31, %32, %cst_15 {dimension_numbers = #tpu.dot_dimension_numbers<[1], [0], [0], [1], [0, 0, 1, 1], [], []>} : vector<32x32xbf16>, vector<32x32xbf16>, vector<32x32xf32> -> vector<32x32xf32>
      %34 = math.tanh %33 : vector<32x32xf32>
      %c0_16 = arith.constant 0 : index
      %c0_17 = arith.constant 0 : index
      %35 = vector.load %arg7[%c0_16, %c0_17] : memref<32x32xf32, #tpu.memory_space<vmem>>, vector<32x32xf32>
      tpu.vector_store %arg7[%c0_16, %c0_17], %34 {strides = array<i32>} : memref<32x32xf32, #tpu.memory_space<vmem>>, vector<32x32xf32>,
      %cst_18 = arith.constant 0.000000e+00 : f32
      %36 = vector.broadcast %cst_18 : f32 to vector<32x32xf32>
      %c0_19 = arith.constant 0 : index
      %c0_20 = arith.constant 0 : index
      %37 = vector.load %arg8[%c0_19, %c0_20] : memref<32x32xf32, #tpu.memory_space<vmem>>, vector<32x32xf32>
      tpu.vector_store %arg8[%c0_19, %c0_20], %36 {strides = array<i32>} : memref<32x32xf32, #tpu.memory_space<vmem>>, vector<32x32xf32>,
    } else {
    }
    %c0 = arith.constant 0 : index
    %c0_1 = arith.constant 0 : index
    %c0_2 = arith.constant 0 : index
    %3 = vector.load %arg3[%c0, %c0_1, %c0_2] : memref<1x32x2xi32, #tpu.memory_space<vmem>>, vector<1x32x2xi32>
    %4 = vector.shape_cast %3 : vector<1x32x2xi32> to vector<32x2xi32>
    %5 = vector.extract_strided_slice %4 {offsets = [0, 0], sizes = [32, 1], strides = [1, 1]} : vector<32x2xi32> to vector<32x1xi32>
    %6 = vector.extract_strided_slice %4 {offsets = [0, 1], sizes = [32, 1], strides = [1, 1]} : vector<32x2xi32> to vector<32x1xi32>
    %7 = tpu.iota {dimensions = array<i32: 1>} : vector<32x128xi32>
    %c128_i32 = arith.constant 128 : i32
    %8 = arith.muli %arg1, %c128_i32 : i32
    %9 = vector.broadcast %8 : i32 to vector<32x128xi32>
    %10 = arith.addi %7, %9 : vector<32x128xi32>
    %11 = vector.broadcast %5 : vector<32x1xi32> to vector<32x128xi32>
    %12 = arith.cmpi eq, %10, %11 : vector<32x128xi32>
    %13 = arith.extui %12 : vector<32x128xi1> to vector<32x128xi32>
    %14 = arith.sitofp %13 : vector<32x128xi32> to vector<32x128xf32>
    %15 = arith.truncf %14 : vector<32x128xf32> to vector<32x128xbf16>
    %16 = vector.broadcast %6 : vector<32x1xi32> to vector<32x128xi32>
    %17 = arith.cmpi eq, %10, %16 : vector<32x128xi32>
    %18 = arith.extui %17 : vector<32x128xi1> to vector<32x128xi32>
    %19 = arith.sitofp %18 : vector<32x128xi32> to vector<32x128xf32>
    %20 = arith.truncf %19 : vector<32x128xf32> to vector<32x128xbf16>
    %21 = arith.subf %15, %20 : vector<32x128xbf16>
    %c0_3 = arith.constant 0 : index
    %c0_4 = arith.constant 0 : index
    %22 = vector.load %arg8[%c0_3, %c0_4] : memref<32x32xf32, #tpu.memory_space<vmem>>, vector<32x32xf32>
    %c0_5 = arith.constant 0 : index
    %c0_6 = arith.constant 0 : index
    %23 = vector.load %arg5[%c0_5, %c0_6] : memref<128x32xbf16, #tpu.memory_space<vmem>>, vector<128x32xbf16>
    %cst = arith.constant dense<0.000000e+00> : vector<32x32xf32>
    %24 = tpu.matmul %21, %23, %cst {dimension_numbers = #tpu.dot_dimension_numbers<[1], [0], [0], [1], [0, 0, 1, 1], [], []>} : vector<32x128xbf16>, vector<128x32xbf16>, vector<32x32xf32> -> vector<32x32xf32>
    %25 = arith.addf %22, %24 : vector<32x32xf32>
    %c0_7 = arith.constant 0 : index
    %c0_8 = arith.constant 0 : index
    %26 = vector.load %arg8[%c0_7, %c0_8] : memref<32x32xf32, #tpu.memory_space<vmem>>, vector<32x32xf32>
    tpu.vector_store %arg8[%c0_7, %c0_8], %25 {strides = array<i32>} : memref<32x32xf32, #tpu.memory_space<vmem>>, vector<32x32xf32>,
    %c1_i32 = arith.constant 1 : i32
    %27 = arith.cmpi eq, %arg1, %c1_i32 : i32
    %28 = arith.extui %27 : i1 to i32
    %c0_i32_9 = arith.constant 0 : i32
    %29 = arith.cmpi ne, %28, %c0_i32_9 : i32
    scf.if %29 {
      %c0_10 = arith.constant 0 : index
      %c0_11 = arith.constant 0 : index
      %30 = vector.load %arg7[%c0_10, %c0_11] : memref<32x32xf32, #tpu.memory_space<vmem>>, vector<32x32xf32>
      %c0_12 = arith.constant 0 : index
      %c0_13 = arith.constant 0 : index
      %31 = vector.load %arg8[%c0_12, %c0_13] : memref<32x32xf32, #tpu.memory_space<vmem>>, vector<32x32xf32>
      %32 = arith.mulf %30, %31 : vector<32x32xf32>
      %cst_14 = arith.constant dense<0.000000e+00> : vector<32xf32>
      %33 = vector.multi_reduction <add>, %32, %cst_14 [1] : vector<32x32xf32> to vector<32xf32>
      %34 = vector.shape_cast %33 : vector<32xf32> to vector<32x1xf32>
      %35 = tpu.iota {dimensions = array<i32: 0>} : vector<32x4xi32>
      %36 = tpu.iota {dimensions = array<i32: 1>} : vector<32x4xi32>
      %c8_i32 = arith.constant 8 : i32
      %37 = vector.broadcast %c8_i32 : i32 to vector<32x4xi32>
      %38 = arith.muli %36, %37 : vector<32x4xi32>
      %39 = arith.cmpi sge, %35, %38 : vector<32x4xi32>
      %c1_i32_15 = arith.constant 1 : i32
      %40 = vector.broadcast %c1_i32_15 : i32 to vector<32x4xi32>
      %41 = arith.addi %36, %40 : vector<32x4xi32>
      %c8_i32_16 = arith.constant 8 : i32
      %42 = vector.broadcast %c8_i32_16 : i32 to vector<32x4xi32>
      %43 = arith.muli %41, %42 : vector<32x4xi32>
      %44 = arith.cmpi slt, %35, %43 : vector<32x4xi32>
      %45 = arith.andi %39, %44 : vector<32x4xi1>
      %46 = arith.extui %45 : vector<32x4xi1> to vector<32x4xi32>
      %47 = arith.sitofp %46 : vector<32x4xi32> to vector<32x4xf32>
      %48 = vector.broadcast %34 : vector<32x1xf32> to vector<32x4xf32>
      %49 = arith.mulf %48, %47 : vector<32x4xf32>
      %cst_17 = arith.constant dense<0.000000e+00> : vector<4xf32>
      %50 = vector.multi_reduction <add>, %49, %cst_17 [0] : vector<32x4xf32> to vector<4xf32>
      %51 = vector.shape_cast %50 : vector<4xf32> to vector<1x4xf32>
      %c0_18 = arith.constant 0 : index
      %c0_19 = arith.constant 0 : index
      %c0_20 = arith.constant 0 : index
      %52 = vector.load %arg6[%c0_18, %c0_19, %c0_20] : memref<1x1x4xf32, #tpu.memory_space<vmem>>, vector<1x1x4xf32>
      %53 = vector.shape_cast %52 : vector<1x1x4xf32> to vector<1x4xf32>
      %54 = vector.shape_cast %51 : vector<1x4xf32> to vector<1x1x4xf32>
      tpu.vector_store %arg6[%c0_18, %c0_19, %c0_20], %54 {strides = array<i32>} : memref<1x1x4xf32, #tpu.memory_space<vmem>>, vector<1x1x4xf32>,
    } else {
    }
    return
  }
  func.func @transform_0(%arg0: i32, %arg1: i32) -> (i32, i32, i32) {
    %c0_i32 = arith.constant 0 : i32
    %c0_i32_0 = arith.constant 0 : i32
    %c0_i32_1 = arith.constant 0 : i32
    return %arg0, %c0_i32, %c0_i32_0 : i32, i32, i32
  }
  func.func @transform_1(%arg0: i32, %arg1: i32) -> (i32, i32, i32) {
    %c0_i32 = arith.constant 0 : i32
    %c0_i32_0 = arith.constant 0 : i32
    %c0_i32_1 = arith.constant 0 : i32
    return %arg0, %c0_i32, %c0_i32_0 : i32, i32, i32
  }
  func.func @transform_2(%arg0: i32, %arg1: i32) -> (i32, i32) {
    %c0_i32 = arith.constant 0 : i32
    %c0_i32_0 = arith.constant 0 : i32
    %c0_i32_1 = arith.constant 0 : i32
    return %c0_i32, %c0_i32_0 : i32, i32
  }
  func.func @transform_3(%arg0: i32, %arg1: i32) -> (i32, i32) {
    %c0_i32 = arith.constant 0 : i32
    %c0_i32_0 = arith.constant 0 : i32
    return %arg1, %c0_i32 : i32, i32
  }
  func.func @transform_4(%arg0: i32, %arg1: i32) -> (i32, i32, i32) {
    %c0_i32 = arith.constant 0 : i32
    %c0_i32_0 = arith.constant 0 : i32
    %c0_i32_1 = arith.constant 0 : i32
    return %arg0, %c0_i32, %c0_i32_0 : i32, i32, i32
  }
}

</mosaic_0001>

<bundles_post_ra>
// kernel: tpu_custom_call.1
= control target key start
LH: loop header
LB: loop body
LE: loop exit
PB: predicated region body
PF: predicated region fallthrough
CT: control target
= control target key end

     0   :  { %s1804_s0 = inlined_call_operand.hbm [shape: bf16[2,32,32], index: 0, kind: input, shape index: {}]   ;;  %s1805_s1 = inlined_call_operand.hbm [shape: s32[2,32,2], index: 1, kind: input, shape index: {}]   ;;  %s1806_s2 = inlined_call_operand.hbm [shape: bf16[32,32], index: 2, kind: input, shape index: {}]   ;;  %s1807_s3 = inlined_call_operand.hbm [shape: bf16[256,32], index: 3, kind: input, shape index: {}]   ;;  %s1808_s4 = inlined_call_operand.hbm [shape: f32[2,1,4], index: 4, kind: output, shape index: {}]  }
   0x1   :  { %1824 = sst [smem:[#allocation22_spill]] %s1804_s0 }
   0x2   :  { %1825 = sst [smem:[#allocation23_spill]] %s1805_s1 }
   0x3   :  { %1826 = sst [smem:[#allocation24_spill]] %s1806_s2 }
   0x4   :  { %1827 = sst [smem:[#allocation25_spill]] %s1808_s4 }
   0x5   :  { %9 = vsyncpa [#allocation5], 0 }
   0x6   :  { %11 = vsyncpa [#allocation5 + $0x1], 0 }
   0x7   :  { %12 = vsyncpa [#allocation8], 0 }
   0x8   :  { %14 = vsyncpa [#allocation8 + $0x1], 0 }
   0x9   :  { %15 = vsyncpa [#allocation11], 0 }
   0xa   :  { %17 = vsyncpa [#allocation11 + $0x1], 0 }
   0xb   :  { %18 = vsyncpa [#allocation6], 0 }
   0xc   :  { %20 = vsyncpa [#allocation6 + $0x1], 0  ;;  %s1381_s15 = smov 0   ;;  %s1383_s16 = smov 0  }
   0xd   :  { %s1385_s17 = smov 0   ;;  %s1387_s18 = smov 0  }
   0xe   :  { %s1389_s19 = smov 0   ;;  %s1391_s20 = smov 0  }
   0xf   :  { %s1393_s21 = smov 0   ;;  %s1395_s22 = smov 0  }
  0x10   :  { %s1397_s23 = smov 0   ;;  %s1399_s24 = smov 0  }
  0x11   :  { %s1401_s25 = smov 0  }
  0x12 LB: > { %1828 = sst [smem:[#allocation18_spill]] %s1312_s18  ;;  %s1435_s26 = sadd.s32 4294967295, %s1340_s25   ;;  %s1340_s25 = sphi %s1401_s25, %s26_s25   ;;  %s1336_s24 = sphi %s1399_s24, %s1870_s24   ;;  %s1332_s23 = sphi %s1397_s23, %s1869_s23   ;;  %s1328_s22 = sphi %s1395_s22, %s1868_s22   ;;  %s1324_s21 = sphi %s1393_s21, %s1867_s21   ;;  %s1320_s20 = sphi %s1391_s20, %s1866_s20   ;;  %s1316_s19 = sphi %s1389_s19, %s1865_s19   ;;  %s1312_s18 = sphi %s1387_s18, %s1864_s18   ;;  %s1308_s17 = sphi %s1385_s17, %s1863_s17   ;;  %s1304_s16 = sphi %s1383_s16, %s1862_s16   ;;  %s1300_s15 = sphi %s1381_s15, %s1861_s15  }
  0x13   : > { %1829 = sst [smem:[#allocation19_spill]] %s1328_s22  ;;  %s836_s27 = sadd.s32 4294967294, %s1340_s25  }
  0x14   : > { %p58_p0 = scmp.ne.s32.totalorder %s1316_s19, %s1312_s18  ;;  %p1809_p1 = scmp.eq.s32.totalorder %s1435_s26, 0 }
  0x15   : > { %p131_p2 = scmp.ne.s32.totalorder %s1304_s16, %s1300_s15  ;;  %p161_p5 = scmp.eq.s32.totalorder %s836_s27, 3 }
  0x16   : > { %p1445_p4 = por %p1809_p1, %p58_p0  ;;  %p837_p7 = scmp.ge.s32.totalorder %s1340_s25, 1 }
  0x17   : > { %p1451_p6 = por %p131_p2, %p1809_p1  ;;  %p1456_p8 = por %p161_p5, %p58_p0 }
  0x18   : > { %s1830_s28 = scalar_select %p1445_p4, 1, 0 }
  0x19   : > { %s1831_s29 = scalar_select %p1451_p6, 1, 0 }
  0x1a   : > { %s1832_s30 = scalar_select %p1456_p8, 1, 0 }
  0x1b   : > { %p168_p9 = scmp.lt.s32.totalorder %s1340_s25, 5  ;;  %s1342_s6 = smov [#allocation9]  }
  0x1c   : > { %1833 = sst [smem:[#allocation20_spill]] %s1832_s30  ;;  %s180_s7 = sshll.u32 %s1342_s6, 4  ;;  %s181_s7 = int_to_ptr.vmem [resolvable:$true] %s180_s7 }
  0x1d   : > { %p1461_p10 = pnand %p837_p7, %p168_p9  ;;  %s1836_s2 = sld [smem:[#allocation24_spill]] }
  0x1f   : > { %s1834_s5 = scalar_select %p1461_p10, 1, 0 }
  0x20   : > { %p943_p11 = pneg %p1461_p10 }
  0x22   : > { %p1469_p12 = pnand %p943_p11, %p1809_p1 }
  0x23   : > { %s1088_s12 = scalar_lea.hbm %s1836_s2, 256 }
  0x24   : > { %p1089_p13 = scmp.ne.s32.totalorder %s1836_s2, %s1088_s12  ;;  %p1090_p0 = pneg %p1469_p12 }
  0x25   : > { %p1095_p7 = scmp.lt.u32.totalorder %s1088_s12, %s1836_s2 }
  0x26   : > { %p1091_p2 = pnand %p1090_p0, %p1089_p13 }
  0x28   : > { %p1092_p5 = pneg %p1091_p2 }
  0x2a   : > { %p1097_p9 = pnand %p1095_p7, %p1092_p5 }
  0x2c   : > { %1100 = shalt.err (!%p1097_p9)
}
  0x2d   : > { %s1101_s6 = scalar_lea.vmem %s181_s7, 256  ;;  %p1109_p8 = scmp.lt.s32.totalorder %s181_s7, %s181_s7 }
  0x2e   : > { %p1102_p11 = scmp.ne.s32.totalorder %s181_s7, %s1101_s6  ;;  %p1110_p6 = scmp.lt.s32.totalorder %s1101_s6, %s1101_s6 }
  0x30   : > { %p1104_p1 = pnand %p1102_p11, %p1090_p0  ;;  %p1111_p4 = por %p1110_p6, %p1109_p8 }
  0x32   : > { %p1105_p3 = pneg %p1104_p1 }
  0x34   : > { %p1112_p10 = pnand %p1111_p4, %p1105_p3 }
  0x36   : > { %1115 = shalt.err (!%p1112_p10)
}
  0x37   : > { %s1813_s10 = smov 64   ;;  %s1815_s11 = smov 4  }
  0x38   : > { %946 = dma.hbm_to_vmem [thread:$0]  (!%p1469_p12), %s1836_s2, 256, %s181_s7, [#allocation8], %s1813_s10, %s1813_s10, %s1815_s11  }
  0x39   : > { %p52_p1 = scmp.ne.s32.totalorder %s1320_s20, %s1316_s19  ;;  %p1820_p3 = scmp.eq.s32.totalorder %s1340_s25, 0 }
  0x3a   : > { %p1819_p4 = scmp.lt.s32.totalorder %s1340_s25, 4  ;;  %s1498_s14 = sand.u32 1, %s1320_s20  }
  0x3b   : > { %p54_p6 = por %p1820_p3, %p52_p1  ;;  %p1837_p8 = scmp.eq.s32.totalorder %s1435_s26, 3 }
  0x3c   : > { %s840_s15 = sshll.u32 %s1498_s14, 4  ;;  %s886_s27 = sshll.u32 %s1336_s24, 8 }
  0x3d   : > { %p1504_p10 = por %p1837_p8, %p52_p1  ;;  %s1840_s0 = sld [smem:[#allocation22_spill]] }
  0x3e   : > { %s198_s13 = scalar_lea.vmem [#allocation4], %s840_s15  ;;  %p1519_p12 = pnand %p1819_p4, %p54_p6 }
  0x3f   : > { %s1838_s8 = scalar_select %p1504_p10, 1, 0 }
  0x40   : > { %s205_s9 = sshll.u32 %s198_s13, 4  ;;  %s843_s2 = sshll.u32 %s1498_s14, 5  ;;  %s1515_s9 = int_to_ptr.vmem [resolvable:$true] %s205_s9 }
  0x41   : > { %1839 = sst [smem:[#allocation21_spill]] %s1838_s8  ;;  %s195_s6 = scalar_lea.sflag [#allocation5], %s1498_s14 }
  0x42   : > { %p1118_p0 = pneg %p1519_p12 }
  0x43   : > { %s1513_s7 = scalar_lea.hbm %s1840_s0, %s886_s27  ;;  %s1121_s13 = scalar_lea.hbm %s1840_s0, 512 }
  0x44   : > { %s1116_s27 = scalar_lea.hbm %s1513_s7, 256  ;;  %p1122_p7 = scmp.lt.u32.totalorder %s1513_s7, %s1840_s0 }
  0x45   : > { %p1117_p13 = scmp.ne.s32.totalorder %s1513_s7, %s1116_s27  ;;  %p1123_p9 = scmp.lt.u32.totalorder %s1121_s13, %s1116_s27 }
  0x46   : > { %p1125_p1 = scmp.lt.u32.totalorder %s1116_s27, %s1513_s7 }
  0x47   : > { %p1119_p2 = pnand %p1118_p0, %p1117_p13  ;;  %p1124_p11 = por %p1123_p9, %p1122_p7 }
  0x49   : > { %p1120_p5 = pneg %p1119_p2  ;;  %p1126_p6 = por %p1125_p1, %p1124_p11 }
  0x4b   : > { %p1127_p8 = pnand %p1126_p6, %p1120_p5 }
  0x4d   : > { %1130 = shalt.err (!%p1127_p8)
}
  0x4e   : > { %s1131_s11 = scalar_lea.vmem %s1515_s9, 256  ;;  %s1345_s15 = smov [#allocation4]  }
  0x4f   : > { %p1132_p13 = scmp.ne.s32.totalorder %s1515_s9, %s1131_s11  ;;  %s1136_s12 = sshll.u32 %s1345_s15, 4  ;;  %s1137_s12 = int_to_ptr.vmem [resolvable:$false] %s1136_s12 }
  0x50   : > { %s1138_s18 = scalar_lea.vmem %s1137_s12, 512  ;;  %p1139_p3 = scmp.lt.s32.totalorder %s1515_s9, %s1137_s12 }
  0x51   : > { %p1134_p2 = pnand %p1132_p13, %p1118_p0  ;;  %p1140_p7 = scmp.lt.s32.totalorder %s1138_s18, %s1131_s11 }
  0x53   : > { %p1135_p4 = pneg %p1134_p2  ;;  %p1141_p9 = por %p1140_p7, %p1139_p3 }
  0x55   : > { %p1142_p11 = pnand %p1141_p9, %p1135_p4 }
  0x57   : > { %1145 = shalt.err (!%p1142_p11)
}
  0x58   : > { %s1842_s30 = smov 4   ;;  %s1843_s27 = smov 64  }
  0x59   : > { %950 = dma.hbm_to_vmem [thread:$0]  (!%p1519_p12), %s1513_s7, 256, %s1515_s9, %s195_s6, %s1843_s27, %s1843_s27, %s1842_s30  }
  0x5a   : > { %s887_s13 = sshll.u32 %s1336_s24, 9  ;;  %s1844_s1 = sld [smem:[#allocation23_spill]] }
  0x5b   : > { %s219_s18 = scalar_lea.vmem [#allocation7], %s843_s2  ;;  %s1845_s4 = sand.u32 1, %s1340_s25  }
  0x5c   : > { %s226_s0 = sshll.u32 %s219_s18, 4  ;;  %s1568_s8 = scalar_lea.sflag [#allocation8], %s1845_s4  ;;  %s1564_s0 = int_to_ptr.vmem [resolvable:$true] %s226_s0 }
  0x60   : > { %s1560_s12 = scalar_lea.hbm %s1844_s1, %s887_s13  ;;  %s1151_s14 = scalar_lea.hbm %s1844_s1, 1024 }
  0x61   : > { %s1146_s22 = scalar_lea.hbm %s1560_s12, 512  ;;  %p1152_p1 = scmp.lt.u32.totalorder %s1560_s12, %s1844_s1 }
  0x62   : > { %p1147_p3 = scmp.ne.s32.totalorder %s1560_s12, %s1146_s22  ;;  %p1153_p6 = scmp.lt.u32.totalorder %s1151_s14, %s1146_s22 }
  0x63   : > { %p1155_p13 = scmp.lt.u32.totalorder %s1146_s22, %s1560_s12 }
  0x64   : > { %p1149_p4 = pnand %p1147_p3, %p1118_p0  ;;  %p1154_p8 = por %p1153_p6, %p1152_p1 }
  0x66   : > { %p1150_p5 = pneg %p1149_p4  ;;  %p1156_p2 = por %p1155_p13, %p1154_p8 }
  0x68   : > { %p1157_p7 = pnand %p1156_p2, %p1150_p5 }
  0x6a   : > { %1160 = shalt.err (!%p1157_p7)
}
  0x6b   : > { %s1161_s2 = scalar_lea.vmem %s1564_s0, 512  ;;  %s1346_s4 = smov [#allocation7]  }
  0x6c   : > { %p1162_p9 = scmp.ne.s32.totalorder %s1564_s0, %s1161_s2  ;;  %s1166_s15 = sshll.u32 %s1346_s4, 4  ;;  %s1167_s15 = int_to_ptr.vmem [resolvable:$false] %s1166_s15 }
  0x6d   : > { %s1168_s11 = scalar_lea.vmem %s1167_s15, 1024  ;;  %p1169_p4 = scmp.lt.s32.totalorder %s1564_s0, %s1167_s15 }
  0x6e   : > { %p1164_p11 = pnand %p1162_p9, %p1118_p0  ;;  %p1170_p1 = scmp.lt.s32.totalorder %s1168_s11, %s1161_s2 }
  0x70   : > { %p1165_p3 = pneg %p1164_p11  ;;  %p1171_p6 = por %p1170_p1, %p1169_p4 }
  0x72   : > { %p1172_p8 = pnand %p1171_p6, %p1165_p3 }
  0x74   : > { %1175 = shalt.err (!%p1172_p8)
}
  0x75   : > { %s1347_s22 = smov 128   ;;  %s1348_s18 = smov 8  }
  0x76   : > { %953 = dma.hbm_to_vmem [thread:$0]  (!%p1519_p12), %s1560_s12, 512, %s1564_s0, %s1568_s8, %s1347_s22, %s1347_s22, %s1348_s18  }
  0x77   : > { %s38_s9 = sadd.s32 1, %s1336_s24  ;;  %s35_s7 = sadd.s32 1, %s1332_s23 }
  0x78   : > { %s118_s14 = sadd.s32 1, %s1308_s17  ;;  %p36_p0 = scmp.ge.s32.totalorder %s35_s7, 2 }
  0x79   : > { %p125_p5 = scmp.ne.s32.totalorder %s1308_s17, %s1304_s16  ;;  %s236_s6 = sand.u32 1, %s1308_s17  }
  0x7a   : > { %s888_s13 = sshll.u32 %s1332_s23, 10  ;;  %s1872_s7 = smov (%p36_p0, %s35_s7), 0 }
  0x7b   : > { %s1874_s9 = smov (!%p36_p0, %s38_s9), %s1336_s24  ;;  %s115_s2 = ssub.s32 %s1332_s23, %s1872_s7 }
  0x7c   : > { %p1846_p13 = scmp.eq.s32.totalorder %s1340_s25, 0  ;;  %p40_p12 = scmp.ge.s32.totalorder %s1874_s9, 2 }
  0x7d   : > { %p116_p7 = scmp.eq.s32.totalorder %s115_s2, 0  ;;  %s846_s0 = sshll.u32 %s236_s6, 6 }
  0x7e   : > { %p127_p2 = por %p125_p5, %p1846_p13  ;;  %s1876_s9 = smov (%p40_p12, %s1874_s9), 0 }
  0x7f   : > { %s1611_s10 = scalar_select %p116_p7, %s1308_s17, %s118_s14  }
  0x80   : > { %s42_s8 = ssub.s32 %s1336_s24, %s1876_s9  ;;  %s1618_s15 = scalar_lea.hbm %s1807_s3, %s888_s13 }
  0x81   : > { %p43_p9 = scmp.eq.s32.totalorder %s42_s8, 0  ;;  %s240_s11 = scalar_lea.vmem [#allocation10], %s846_s0 }
  0x82   : > { %s247_s22 = sshll.u32 %s240_s11, 4  ;;  %p1847_p11 = scmp.lt.s32.totalorder %s1340_s25, 4  ;;  %s1631_s22 = int_to_ptr.vmem [resolvable:$true] %s247_s22 }
  0x83   : > { %s1849_s14 = sadd.s32 1, %s1320_s20  ;;  %s1633_s13 = scalar_lea.sflag [#allocation11], %s236_s6 }
  0x84   : > { %p1622_p3 = pnand %p1847_p11, %p127_p2  ;;  %s1176_s8 = scalar_lea.hbm %s1618_s15, 1024 }
  0x85   : > { %s1629_s2 = scalar_select %p43_p9, %s1320_s20, %s1849_s14  }
  0x86   : > { %p1177_p4 = scmp.ne.s32.totalorder %s1618_s15, %s1176_s8  ;;  %p1178_p1 = pneg %p1622_p3 }
  0x87   : > { %s1181_s4 = scalar_lea.hbm %s1807_s3, 2048  ;;  %p1182_p0 = scmp.lt.u32.totalorder %s1618_s15, %s1807_s3 }
  0x88   : > { %p1179_p6 = pnand %p1178_p1, %p1177_p4  ;;  %p1183_p5 = scmp.lt.u32.totalorder %s1181_s4, %s1176_s8 }
  0x89   : > { %p1185_p2 = scmp.lt.u32.totalorder %s1176_s8, %s1618_s15 }
  0x8a   : > { %p1180_p8 = pneg %p1179_p6  ;;  %p1184_p13 = por %p1183_p5, %p1182_p0 }
  0x8c   : > { %p1186_p12 = por %p1185_p2, %p1184_p13 }
  0x8e   : > { %p1187_p7 = pnand %p1186_p12, %p1180_p8 }
  0x90   : > { %1190 = shalt.err (!%p1187_p7)
}
  0x91   : > { %s1191_s6 = scalar_lea.vmem %s1631_s22, 1024  ;;  %s1349_s14 = smov [#allocation10]  }
  0x92   : > { %p1192_p9 = scmp.ne.s32.totalorder %s1631_s22, %s1191_s6  ;;  %s1196_s0 = sshll.u32 %s1349_s14, 4  ;;  %s1197_s0 = int_to_ptr.vmem [resolvable:$false] %s1196_s0 }
  0x93   : > { %s1198_s1 = scalar_lea.vmem %s1197_s0, 2048  ;;  %p1199_p6 = scmp.lt.s32.totalorder %s1631_s22, %s1197_s0 }
  0x94   : > { %p1194_p11 = pnand %p1192_p9, %p1178_p1  ;;  %p1200_p0 = scmp.lt.s32.totalorder %s1198_s1, %s1191_s6 }
  0x96   : > { %p1195_p4 = pneg %p1194_p11  ;;  %p1201_p5 = por %p1200_p0, %p1199_p6 }
  0x98   : > { %p1202_p13 = pnand %p1201_p5, %p1195_p4 }
  0x9a   : > { %1205 = shalt.err (!%p1202_p13)
}
  0x9b   : > { %956 = dma.hbm_to_vmem [thread:$0]  (!%p1622_p3), %s1618_s15, 1024, %s1631_s22, %s1633_s13, %s1843_s27, %s1843_s27, %s1842_s30  }
  0x9c   : > { %p1850_p1 = scmp.ne.s32.totalorder %s1834_s5, 0 }
  0x9d   : > { %s1667_s8 = sand.u32 (!%p1850_p1), 1, %s1316_s19   ;;  %p1851_p8 = scmp.ne.s32.totalorder (!%p1850_p1), %s1830_s28, 0 }
  0x9e   : > { %259 = sbr.rel (%p1850_p1) target bundleno = 982 (0x3d6), region = 36  ;;  %s850_s12 = sshll.u32 (!%p1850_p1), %s1667_s8, 4 }
  0x9f   : > { %s262_s4 = scalar_lea.sflag (!%p1850_p1), [#allocation5], %s1667_s8  ;;  %s1671_s11 = scalar_lea.vmem (!%p1850_p1), [#allocation4], %s850_s12 }
  0xa5   : > { %1279 = dma.done.wait (%p1851_p8), %s262_s4, 256  }
  0xa6   : > { %1281 = vsyncadd (%p1851_p8), %s262_s4, 4294967040  ;;  %s270_s5 = sand.u32 1, %s1435_s26   ;;  %s851_s30 = sshll.u32 %s1667_s8, 5 }
  0xa7   : > { %s271_s27 = scalar_lea.sflag [#allocation8], %s270_s5  ;;  %s1679_s15 = scalar_lea.vmem [#allocation7], %s851_s30 }
  0xa8   : > { %1283 = dma.done.wait (%p1851_p8), %s271_s27, 512  }
  0xa9   : > { %1285 = vsyncadd (%p1851_p8), %s271_s27, 4294966784  ;;  %p1852_p3 = scmp.eq.s32.totalorder %s1435_s26, 0 }
  0xab   : > { %1287 = dma.done.wait (%p1852_p3), [#allocation8], 256   ;;  %p1853_p2 = pmov %p1852_p3 }
  0xac   : > { %s283_s22 = sand.u32 1, %s1304_s16   ;;  %p1854_p12 = scmp.ne.s32.totalorder %s1831_s29, 0 }
  0xad   : > { %1289 = vsyncadd (%p1853_p2), [#allocation8], 4294967040  ;;  %s853_s18 = sshll.u32 %s283_s22, 6  ;;  %s284_s13 = scalar_lea.sflag [#allocation11], %s283_s22 }
  0xae   : > { %s1690_s6 = scalar_lea.vmem [#allocation10], %s853_s18 }
  0xaf   : > { %1291 = dma.done.wait (%p1854_p12), %s284_s13, 1024  }
  0xb0   : > { %1293 = vsyncadd (%p1854_p12), %s284_s13, 4294966272  ;;  %s320_s28 = scalar_lea.vmem [#allocation12], %s1667_s8  ;;  %p854_p7 = scmp.ne.s32.totalorder %s1324_s21, 0 }
  0xb1   : > { %v1063_v0 = vld [vmem:[#allocation9] sm:$0xff] (!%p854_p7)   ;;  %vm357_vm0 = vcmask (!%p854_p7), 261120   ;;  %v1064_v1 = vld [vmem:[#allocation9 + $0x8] sm:$0xff] (!%p854_p7)   ;;  %v1350_v3 = vmov (!%p854_p7), 0.0  }
  0xb2   : > { %326 = sbr.rel (%p854_p7) target bundleno = 413 (0x19d), region = 56  ;;  %903 = vmatprep.subr.bf16.mxu0 (!%p854_p7), %v1063_v0  ;;  %v1065_v2 = vld [vmem:[%s1671_s11] sm:$0xff] (!%p854_p7)   ;;  %421 = vst.msk [vmem:[#allocation3] sm:$0xff] (!%p854_p7), %vm357_vm0, %v1350_v3  ;;  %422 = vst.msk [vmem:[#allocation3 + $0x8] sm:$0xff] (!%p854_p7), %vm357_vm0, %v1350_v3  ;;  %v1066_v4 = vld [vmem:[%s1671_s11 + $0x8] sm:$0xff] (!%p854_p7)  }
  0xb3   : > { %423 = vst.msk [vmem:[#allocation3 + $0x10] sm:$0xff] (!%p854_p7), %vm357_vm0, %v1350_v3  ;;  %424 = vst.msk [vmem:[#allocation3 + $0x18] sm:$0xff] (!%p854_p7), %vm357_vm0, %v1350_v3  ;;  %904 = vmatpush3.bf16.msra.mxu0 (!%p854_p7), %v1063_v0  ;;  %907 = vmatprep.mubr.msk.bf16.mxu0 (!%p854_p7), %vm357_vm0, %v1065_v2 }
  0xb4   : > { %905 = vmatprep.subr.bf16.mxu0 (!%p854_p7), %v1064_v1 }
  0xb7   : > { %906 = vmatpush3.bf16.msra.mxu0 (!%p854_p7), %v1064_v1 }
  0xba   : > { %908 = vmatmul.mubr.msk.bf16.vlgmr.msra.gmra.mrb[0].mxu0 %vm357_vm0, %v1066_v4 }
 0x18d   : > { %v909_v5 = vpop.f32.mrb[0].mxu0 }
 0x18e   : > { %1067 = vtanh.f32 %v909_v5  ;;  %v398_v6 = vpop.f32.mrb[1].mxu0 }
 0x18f   : > { %1069 = vtanh.f32 %v398_v6  ;;  %v910_v7 = vpop.f32.mrb[2].mxu0 }
 0x190   : > { %1071 = vtanh.f32 %v910_v7  ;;  %v401_v8 = vpop.f32.mrb[3].mxu0 }
 0x191   : > { %1073 = vtanh.f32 %v401_v8 }
 0x198   : > { %v1068_v9 = vpop.eup %1067 }
 0x199   : > { %v1070_v10 = vpop.eup %1069  ;;  %419 = vst.msk [vmem:[#allocation2 + $0x10] sm:$0xff] %vm357_vm0, %v1068_v9 }
 0x19a   : > { %v1072_v11 = vpop.eup %1071  ;;  %417 = vst.msk [vmem:[#allocation2] sm:$0xff] %vm357_vm0, %v1070_v10 }
 0x19b   : > { %v1074_v12 = vpop.eup %1073  ;;  %420 = vst.msk [vmem:[#allocation2 + $0x18] sm:$0xff] %vm357_vm0, %v1072_v11 }
 0x19c   : > { %418 = vst.msk [vmem:[#allocation2 + $0x8] sm:$0xff] %vm357_vm0, %v1074_v12 }
 0x19d PF: > { %v425_v13 = vld [vmem:[%s1679_s15] sm:$0xff]  ;;  %v1351_v14 = vmov 1   ;;  %v1352_v15 = vmov 0   ;;  %v426_v16 = vld [vmem:[%s1679_s15 + $0x8] sm:$0xff]  ;;  %v1080_v17 = vld [vmem:[%s1690_s6] sm:$0xff]   ;;  %v429_v27 = vlaneseq  ;;  %s861_s26 = sshll.u32 %s1324_s21, 7 }
 0x19e   : > { %1076 = vset.pattern.permute.xlu1 %v1351_v14  ;;  %1075 = vset.pattern.permute.xlu0 %v1352_v15  ;;  %v1081_v18 = vld [vmem:[%s1690_s6 + $0x8] sm:$0xff]   ;;  %v427_v19 = vld [vmem:[%s1679_s15 + $0x10] sm:$0xff]  ;;  %v1082_v20 = vld [vmem:[%s1690_s6 + $0x10] sm:$0xff]   ;;  %v432_v29 = vstv %s861_s26  ;;  %v1353_v35 = vmov 0.0   ;;  %vm609_vm9 = vcmask 261120   ;;  %p878_p9 = scmp.ne.s32.totalorder %s1324_s21, 1 }
 0x19f   : > { %461 = vperm.xlu1 %1076, %v425_v13   ;;  %435 = vperm.xlu0 %1075, %v425_v13   ;;  %v428_v21 = vld [vmem:[%s1679_s15 + $0x18] sm:$0xff]  ;;  %v1083_v22 = vld [vmem:[%s1690_s6 + $0x18] sm:$0xff]   ;;  %v1084_v23 = vld [vmem:[%s1690_s6 + $0x20] sm:$0xff]   ;;  %v1724_v28 = vand.u32 127, %v429_v27 }
 0x1a0   : > { %911 = vmatprep.subr.bf16.mxu0 %v1080_v17  ;;  %v1085_v24 = vld [vmem:[%s1690_s6 + $0x28] sm:$0xff]   ;;  %v1086_v25 = vld [vmem:[%s1690_s6 + $0x30] sm:$0xff]   ;;  %v1087_v26 = vld [vmem:[%s1690_s6 + $0x38] sm:$0xff]  }
 0x1a1   : > { %912 = vmatpush3.bf16.msra.mxu0 %v1080_v17  ;;  %v433_v30 = vadd.s32 %v432_v29, %v1724_v28  ;;  %v490_v54 = vld [vmem:[#allocation3 + $0x10] sm:$0xff]  ;;  %v488_v55 = vld [vmem:[#allocation3] sm:$0xff]  ;;  %v491_v57 = vld [vmem:[#allocation3 + $0x18] sm:$0xff] }
 0x1a2   : > { %913 = vmatprep.subr.bf16.mxu0 %v1081_v18  ;;  %v489_v60 = vld [vmem:[#allocation3 + $0x8] sm:$0xff]  ;;  %v618_v2 = vld [vmem:[#allocation2] sm:$0xff] (!%p878_p9)  ;;  %v620_v4 = vld [vmem:[#allocation2 + $0x10] sm:$0xff] (!%p878_p9) }
 0x1a3   : > { %464 = vperm.xlu1 %1076, %v426_v16   ;;  %438 = vperm.xlu0 %1075, %v426_v16   ;;  %v619_v7 = vld [vmem:[#allocation2 + $0x8] sm:$0xff] (!%p878_p9)  ;;  %v621_v11 = vld [vmem:[#allocation2 + $0x18] sm:$0xff] (!%p878_p9) }
 0x1a5   : > { %914 = vmatpush3.bf16.msra.mxu0 %v1081_v18  ;;  %v652_v18 = vadd.s32 (!%p878_p9), 1, %v1724_v28 }
 0x1a6   : > { %915 = vmatprep.subr.bf16.mxu0 %v1082_v20 }
 0x1a7   : > { %1077 = vset.pattern.permute.xlu1 %v1352_v15  ;;  %441 = vperm.xlu0 %1075, %v427_v19  }
 0x1a8   : > { %444 = vperm.xlu1 %1077, %v428_v21  }
 0x1a9   : > { %916 = vmatpush3.bf16.msra.mxu0 %v1082_v20  ;;  %v647_v20 = vmul.u32 (!%p878_p9), 8, %v1724_v28 }
 0x1aa   : > { %917 = vmatprep.subr.bf16.mxu0 %v1083_v22 }
 0x1ab   : > { %1078 = vset.pattern.permute.xlu0 %v1351_v14 }
 0x1ac   : > { %1079 = vset.pattern.permute.xlu1 %v1351_v14  ;;  %467 = vperm.xlu0 %1078, %v427_v19   ;;  %v643_v19 = vshrl.u32 (!%p878_p9), %v429_v27, 7 }
 0x1ad   : > { %470 = vperm.xlu1 %1079, %v428_v21   ;;  %918 = vmatpush3.bf16.msra.mxu0 %v1083_v22  ;;  %v653_v21 = vmul.u32 (!%p878_p9), 8, %v652_v18 }
 0x1ae   : > { %919 = vmatprep.subr.bf16.mxu0 %v1084_v23  ;;  %v645_v22 = vadd.s32 (!%p878_p9), 16, %v643_v19  ;;  %vm648_vm10 = vcmp.ge.s32.totalorder (!%p878_p9), %v643_v19, %v647_v20 }
 0x1af   : > { %vm654_vm11 = vcmp.lt.s32.totalorder (!%p878_p9), %v643_v19, %v653_v21 }
 0x1b0   : > { %vm650_vm12 = vcmp.ge.s32.totalorder (!%p878_p9), %v645_v22, %v647_v20  ;;  %vm656_vm13 = vcmp.lt.s32.totalorder (!%p878_p9), %v645_v22, %v653_v21  ;;  %vm658_vm0 = vmand (!%p878_p9), %vm648_vm10, %vm654_vm11 }
 0x1b1   : > { %920 = vmatpush3.bf16.msra.mxu0 %v1084_v23  ;;  %v644_v23 = vadd.s32 (!%p878_p9), 8, %v643_v19 }
 0x1b2   : > { %921 = vmatprep.subr.bf16.mxu0 %v1085_v24 }
 0x1b3   : > { %vm649_vm14 = vcmp.ge.s32.totalorder (!%p878_p9), %v644_v23, %v647_v20  ;;  %vm655_vm15 = vcmp.lt.s32.totalorder (!%p878_p9), %v644_v23, %v653_v21 }
 0x1b5   : > { %922 = vmatpush3.bf16.msra.mxu0 %v1085_v24  ;;  %v646_v24 = vadd.s32 (!%p878_p9), 24, %v643_v19 }
 0x1b6   : > { %923 = vmatprep.subr.bf16.mxu0 %v1086_v25 }
 0x1b9   : > { %924 = vmatpush3.bf16.msra.mxu0 %v1086_v25  ;;  %v1354_v25 = vmov (!%p878_p9), 0.0  }
 0x1ba   : > { %925 = vmatprep.subr.bf16.mxu0 %v1087_v26 }
 0x1bd   : > { %926 = vmatpush3.bf16.msra.mxu0 %v1087_v26  ;;  %v879_v26 = vsel (!%p878_p9), %vm658_vm0, 1.0, %v1354_v25 }
 0x21e   : > { %v462_v31 = vpop.permute.xlu1 %461  ;;  %v436_v32 = vpop.permute.xlu0 %435 }
 0x21f   : > { %vm472_vm1 = vcmp.eq.s32.totalorder %v433_v30, %v462_v31  ;;  %vm446_vm2 = vcmp.eq.s32.totalorder %v433_v30, %v436_v32 }
 0x220   : > { %v866_v36 = vsel %vm472_vm1, 1.0, %v1353_v35  ;;  %v862_v37 = vsel %vm446_vm2, 1.0, %v1353_v35  ;;  %vm651_vm1 = vcmp.ge.s32.totalorder (!%p878_p9), %v646_v24, %v647_v20  ;;  %vm657_vm2 = vcmp.lt.s32.totalorder (!%p878_p9), %v646_v24, %v653_v21 }
 0x222   : > { %v465_v33 = vpop.permute.xlu1 %464  ;;  %v439_v34 = vpop.permute.xlu0 %438 }
 0x223   : > { %vm473_vm3 = vcmp.eq.s32.totalorder %v433_v30, %v465_v33  ;;  %vm447_vm4 = vcmp.eq.s32.totalorder %v433_v30, %v439_v34 }
 0x224   : > { %v867_v38 = vsel %vm473_vm3, 1.0, %v1353_v35  ;;  %v863_v39 = vsel %vm447_vm4, 1.0, %v1353_v35  ;;  %vm660_vm3 = vmand (!%p878_p9), %vm650_vm12, %vm656_vm13 }
 0x225   : > { %v458_v40 = vpack.c.bf16 %v863_v39, %v862_v37  ;;  %v484_v41 = vpack.c.bf16 %v867_v38, %v866_v36  ;;  %vm659_vm4 = vmand (!%p878_p9), %vm649_vm14, %vm655_vm15  ;;  %v881_v29 = vsel (!%p878_p9), %vm660_vm3, 1.0, %v1354_v25 }
 0x226   : > { %v442_v42 = vpop.permute.xlu0 %441 }
 0x227   : > { %v445_v43 = vpop.permute.xlu1 %444  ;;  %v486_v44 = vsub.bf16 %v458_v40, %v484_v41  ;;  %vm448_vm5 = vcmp.eq.s32.totalorder %v433_v30, %v442_v42 }
 0x228   : > { %vm449_vm6 = vcmp.eq.s32.totalorder %v433_v30, %v445_v43  ;;  %v864_v46 = vsel %vm448_vm5, 1.0, %v1353_v35  ;;  %vm661_vm5 = vmand (!%p878_p9), %vm651_vm1, %vm657_vm2 }
 0x229   : > { %927 = vmatprep.mubr.bf16.mxu0 %v486_v44  ;;  %v865_v47 = vsel %vm449_vm6, 1.0, %v1353_v35  ;;  %v882_v32 = vsel (!%p878_p9), %vm661_vm5, 1.0, %v1354_v25  ;;  %vm674_vm6 = vcmask (!%p878_p9), 31744  }
 0x22a   : > { %v459_v51 = vpack.c.bf16 %v865_v47, %v864_v46 }
 0x22b   : > { %v468_v45 = vpop.permute.xlu0 %467 }
 0x22c   : > { %v471_v48 = vpop.permute.xlu1 %470  ;;  %vm474_vm7 = vcmp.eq.s32.totalorder %v433_v30, %v468_v45 }
 0x22d   : > { %vm475_vm8 = vcmp.eq.s32.totalorder %v433_v30, %v471_v48  ;;  %v868_v49 = vsel %vm474_vm7, 1.0, %v1353_v35  ;;  %v880_v30 = vsel (!%p878_p9), %vm659_vm4, 1.0, %v1354_v25  ;;  %vm688_vm7 = vcmask (!%p878_p9), 24576  }
 0x22e   : > { %v869_v50 = vsel %vm475_vm8, 1.0, %v1353_v35 }
 0x22f   : > { %v485_v52 = vpack.c.bf16 %v869_v50, %v868_v49 }
 0x231   : > { %v487_v53 = vsub.bf16 %v459_v51, %v485_v52 }
 0x233   : > { %928 = vmatmul.mubr.bf16.vlgmr.msra.gmra.mrb[0].mxu0 %v487_v53 }
 0x306   : > { %v929_v56 = vpop.f32.mrb[0].mxu0  ;;  %617 = sbr.rel (%p878_p9) target bundleno = 957 (0x3bd), region = 60 }
 0x307   : > { %v607_v58 = vadd.f32 %v929_v56, %v490_v54  ;;  %v590_v59 = vpop.f32.mrb[1].mxu0 }
 0x308   : > { %v605_v61 = vadd.f32 %v590_v59, %v488_v55  ;;  %v930_v62 = vpop.f32.mrb[2].mxu0 }
 0x309   : > { %612 = vst.msk [vmem:[#allocation3 + $0x10] sm:$0xff] %vm609_vm9, %v607_v58  ;;  %v608_v63 = vadd.f32 %v930_v62, %v491_v57  ;;  %v593_v0 = vpop.f32.mrb[3].mxu0 }
 0x30a   : > { %610 = vst.msk [vmem:[#allocation3] sm:$0xff] %vm609_vm9, %v605_v61  ;;  %v606_v1 = vadd.f32 %v593_v0, %v489_v60 }
 0x30b   : > { %613 = vst.msk [vmem:[#allocation3 + $0x18] sm:$0xff] %vm609_vm9, %v608_v63 }
 0x30c   : > { %611 = vst.msk [vmem:[#allocation3 + $0x8] sm:$0xff] %vm609_vm9, %v606_v1 }
 0x310   : > { %v624_v6 = vld [vmem:[#allocation3 + $0x10] sm:$0xff] }
 0x311   : > { %v622_v3 = vld [vmem:[#allocation3] sm:$0xff]  ;;  %v628_v9 = vmul.f32 %v624_v6, %v620_v4 }
 0x312   : > { %v626_v5 = vmul.f32 %v622_v3, %v618_v2  ;;  %v625_v12 = vld [vmem:[#allocation3 + $0x18] sm:$0xff] }
 0x313   : > { %v623_v8 = vld [vmem:[#allocation3 + $0x8] sm:$0xff]  ;;  %v629_v14 = vmul.f32 %v625_v12, %v621_v11  ;;  %v636_v15 = vsel %vm609_vm9, %v628_v9, 0.0 }
 0x314   : > { %v627_v10 = vmul.f32 %v623_v8, %v619_v7  ;;  %v630_v13 = vsel %vm609_vm9, %v626_v5, 0.0  ;;  %637 = vadd.xlane.f32.xlu1 %v636_v15 }
 0x315   : > { %631 = vadd.xlane.f32.xlu0 %v630_v13  ;;  %v639_v17 = vsel %vm609_vm9, %v629_v14, 0.0 }
 0x316   : > { %v633_v16 = vsel %vm609_vm9, %v627_v10, 0.0 }
 0x318   : > { %640 = vadd.xlane.f32.xlu1 %v639_v17 }
 0x319   : > { %634 = vadd.xlane.f32.xlu0 %v633_v16 }
 0x3a1   : > { %v638_v28 = vpop.xlane.xlu1 %637 }
 0x3a2   : > { %v632_v27 = vpop.xlane.xlu0 %631  ;;  %v672_v34 = vmul.f32 %v881_v29, %v638_v28 }
 0x3a3   : > { %v670_v31 = vmul.f32 %v879_v26, %v632_v27 }
 0x3a4   : > { %v678_v41 = vsel %vm674_vm6, %v672_v34, 0.0 }
 0x3a5   : > { %v641_v36 = vpop.xlane.xlu1 %640  ;;  %v675_v38 = vsel %vm674_vm6, %v670_v31, 0.0 }
 0x3a6   : > { %v635_v33 = vpop.xlane.xlu0 %634  ;;  %v673_v37 = vmul.f32 %v882_v32, %v641_v36 }
 0x3a7   : > { %v671_v35 = vmul.f32 %v880_v30, %v635_v33 }
 0x3a8   : > { %v680_v42 = vsel %vm674_vm6, %v673_v37, 0.0 }
 0x3a9   : > { %v676_v39 = vsel %vm674_vm6, %v671_v35, 0.0 }
 0x3aa   : > { %v677_v40 = vadd.f32 %v676_v39, %v675_v38 }
 0x3ac   : > { %v679_v43 = vadd.f32 %v678_v41, %v677_v40 }
 0x3ae   : > { %v681_v44 = vadd.f32 %v680_v42, %v679_v43 }
 0x3b0   : > { %v682_v45 = vrot.slane %v681_v44, 4 }
 0x3b2   : > { %v683_v46 = vadd.f32 %v682_v45, %v681_v44 }
 0x3b4   : > { %v684_v47 = vrot.slane %v683_v46, 2 }
 0x3b6   : > { %v685_v48 = vadd.f32 %v684_v47, %v683_v46 }
 0x3b8   : > { %v686_v49 = vrot.slane %v685_v48, 1 }
 0x3ba   : > { %v687_v50 = vadd.f32 %v686_v49, %v685_v48 }
 0x3bc   : > { %689 = vst.msk [vmem:[%s320_s28] sm:$0x1] %vm688_vm7, %v687_v50 }
 0x3bd PF: > { %s1855_s21 = sld [smem:[#allocation19_spill]]  ;;  %s1857_s12 = sld [smem:[#allocation25_spill]] }
 0x3be   : > { %s703_s11 = sshll.u32 %s320_s28, 4  ;;  %s691_s5 = scalar_lea.sflag [#allocation6], %s1667_s8  ;;  %s704_s11 = int_to_ptr.vmem [resolvable:$true] %s703_s11 }
 0x3bf   : > { %s1206_s30 = scalar_lea.vmem %s704_s11, 16  ;;  %s1355_s27 = smov [#allocation12]  }
 0x3c0   : > { %p1207_p11 = scmp.ne.s32.totalorder %s704_s11, %s1206_s30  ;;  %s1210_s15 = sshll.u32 %s1355_s27, 4  ;;  %s1211_s15 = int_to_ptr.vmem [resolvable:$false] %s1210_s15 }
 0x3c1   : > { %s1212_s22 = scalar_lea.vmem %s1211_s15, 32  ;;  %p1213_p0 = scmp.lt.s32.totalorder %s704_s11, %s1211_s15 }
 0x3c2   : > { %p1208_p4 = pnand %p1207_p11, %p1504_p10  ;;  %p1214_p5 = scmp.lt.s32.totalorder %s1212_s22, %s1206_s30 }
 0x3c3   : > { %s883_s14 = sshll.u32 %s1855_s21, 4 }
 0x3c4   : > { %s1745_s4 = scalar_lea.hbm %s1857_s12, %s883_s14  ;;  %p1209_p6 = pneg %p1208_p4 }
 0x3c5   : > { %p1215_p13 = por %p1214_p5, %p1213_p0 }
 0x3c7   : > { %p1216_p1 = pnand %p1215_p13, %p1209_p6 }
 0x3c9   : > { %1219 = shalt.err (!%p1216_p1)
}
 0x3ca   : > { %s1220_s8 = scalar_lea.hbm %s1745_s4, 16  ;;  %s1224_s6 = scalar_lea.hbm %s1857_s12, 32 }
 0x3cb   : > { %p1221_p8 = scmp.ne.s32.totalorder %s1745_s4, %s1220_s8  ;;  %p1225_p12 = scmp.lt.u32.totalorder %s1745_s4, %s1857_s12 }
 0x3cc   : > { %p1226_p7 = scmp.lt.u32.totalorder %s1224_s6, %s1220_s8  ;;  %p1228_p11 = scmp.lt.u32.totalorder %s1220_s8, %s1745_s4 }
 0x3cd   : > { %p1222_p3 = pnand %p1221_p8, %p1504_p10 }
 0x3ce   : > { %p1227_p9 = por %p1226_p7, %p1225_p12 }
 0x3cf   : > { %p1223_p2 = pneg %p1222_p3 }
 0x3d0   : > { %p1229_p4 = por %p1228_p11, %p1227_p9 }
 0x3d2   : > { %p1230_p6 = pnand %p1229_p4, %p1223_p2 }
 0x3d4   : > { %1233 = shalt.err (!%p1230_p6)
}
 0x3d5   : > { %941 = dma.vmem_to_hbm [thread:$0]  (%p1504_p10), %s704_s11, 16, %s1745_s4, %s691_s5  }
 0x3d6 PF: > { %s1858_s21 = sld [smem:[#allocation18_spill]]  ;;  %s1859_s14 = sld [smem:[#allocation20_spill]] }
 0x3d7   : > { %p964_p0 = scmp.ge.s32.totalorder %s1340_s25, 2 }
 0x3dc   : > { %s715_s0 = sand.u32 1, %s1858_s21   ;;  %p1860_p5 = scmp.ne.s32.totalorder %s1859_s14, 0 }
 0x3dd   : > { %s716_s1 = scalar_lea.sflag [#allocation6], %s715_s0 }
 0x3de   : > { %p958_p13 = pnand %p964_p0, %p1860_p5 }
 0x3e0   : > { %1295 = dma.done.wait (!%p958_p13), %s716_s1, 16  }
 0x3e1   : > { %1297 = vsyncadd (!%p958_p13), %s716_s1, 4294967280  ;;  %s26_s25 = sadd.s32 1, %s1340_s25   ;;  %s1861_s15 = smov %s1304_s16 }
 0x3e2   : > { %p23_p1 = scmp.ge.s32.totalorder %s26_s25, 6   ;;  %s1862_s16 = smov %s1308_s17 }
 0x3e3   : > { %s1863_s17 = smov %s1611_s10  ;;  %s1864_s18 = smov %s1316_s19 }
 0x3e4   : > { %s1865_s19 = smov %s1320_s20  ;;  %s1866_s20 = smov %s1629_s2 }
 0x3e5   : > { %s1867_s21 = smov %s1332_s23  ;;  %s1868_s22 = smov %s1336_s24 }
 0x3e6   : > { %s1869_s23 = smov %s1872_s7  ;;  %s1870_s24 = smov %s1876_s9 }
 0x3e7   :  { %25 = sbr.rel (!%p23_p1) target bundleno = 18 (0x12), region = 119 }
 0x3ee   :  { %720 = vsyncpa [#allocation5], 1 }
 0x3ef   :  { %722 = vsyncpa [#allocation5 + $0x1], 1 }
 0x3f0   :  { %723 = vsyncpa [#allocation8], 1 }
 0x3f1   :  { %725 = vsyncpa [#allocation8 + $0x1], 1 }
 0x3f2   :  { %726 = vsyncpa [#allocation11], 1 }
 0x3f3   :  { %728 = vsyncpa [#allocation11 + $0x1], 1 }
 0x3f4   :  { %729 = vsyncpa [#allocation6], 1 }
 0x3f5   :  { %731 = vsyncpa [#allocation6 + $0x1], 1 }

</bundles_post_ra>
